<compile_context>
chip_gen: v7x
topology: tpu7x:2x2x1
jax: 0.10.0
libtpu: 0.0.40
codegen_flags: <defaults>
</compile_context>

<pallas_src>
import jax
import jax.numpy as jnp
from jax.experimental import pallas as pl
from jax.experimental.pallas import tpu as pltpu


# ------------------------------- config -------------------------------------
class Config:
    hidden_size = 128      # multiple of 128 -> lane-dense output stores
    num_channels = 3
    image_size = 16
    patch_size = 4


CFG = Config()
NUM_PATCHES = (CFG.image_size // CFG.patch_size) ** 2           # 16
PATCH_DIM = CFG.num_channels * CFG.patch_size * CFG.patch_size  # 48


# ------------------------------- kernel -------------------------------------
def embeddings_kernel(patches_ref, wt_ref, b_ref, pos_ref, o_ref):
    # patches_ref : (B*N, C*P*P)  flattened image patches
    # wt_ref      : (C*P*P, D)    conv weight, pre-transposed on the host
    # b_ref       : (1, D)        conv bias
    # pos_ref     : (B*N, D)      position embeddings (broadcast over batch)
    # o_ref       : (B*N, D)      lane-dense output (D = 128)
    y = jnp.dot(patches_ref[...], wt_ref[...],
                preferred_element_type=jnp.float32)
    o_ref[...] = y + b_ref[...] + pos_ref[...]


# ------------------------------- wrapper ------------------------------------
def siglip_vision_embeddings(pixel_values, conv_w, conv_b, pos_emb):
    """pixel_values (B, C, H, W) -> embeddings (B, num_patches, D)."""
    B, C, H, W = pixel_values.shape
    D, _, P, _ = conv_w.shape
    Hp, Wp = H // P, W // P
    N = Hp * Wp

    # ---- layout plumbing (no compute): non-overlapping patch extraction ----
    # Patch feature order is (c, kh, kw), matching Conv2d's (D, C, P, P) weight.
    patches = (pixel_values
               .reshape(B, C, Hp, P, Wp, P)
               .transpose(0, 2, 4, 1, 3, 5)          # (B, Hp, Wp, C, P, P)
               .reshape(B * N, C * P * P))

    wt = conv_w.reshape(D, C * P * P).T              # pre-transposed: (Kp, D)
    bias = conv_b.reshape(1, D)
    pos = jnp.broadcast_to(pos_emb[None], (B, N, D)).reshape(B * N, D)

    flops = 2 * (B * N) * (C * P * P) * D
    bytes_accessed = 4 * (patches.size + wt.size + bias.size
                          + pos.size + B * N * D)

    out = pl.pallas_call(
        embeddings_kernel,
        out_shape=jax.ShapeDtypeStruct((B * N, D), jnp.float32),
        in_specs=[pl.BlockSpec(memory_space=pltpu.MemorySpace.VMEM)] * 4,
        out_specs=pl.BlockSpec(memory_space=pltpu.MemorySpace.VMEM),
        cost_estimate=pl.CostEstimate(
            flops=flops, transcendentals=0, bytes_accessed=bytes_accessed),
    )(patches, wt, bias, pos)

    return out.reshape(B, N, D)


# ------------------------------ reference -----------------------------------
def reference_forward(pixel_values, conv_w, conv_b, pos_emb):
    """Pure-JAX reference with a real strided conv (intended PyTorch semantics)."""
    P = conv_w.shape[-1]
    out = jax.lax.conv_general_dilated(
        pixel_values, conv_w, window_strides=(P, P), padding="VALID",
        dimension_numbers=("NCHW", "OIHW", "NCHW"))
    out = out + conv_b[None, :, None, None]
    B, D, Hp, Wp = out.shape
    emb = out.reshape(B, D, Hp * Wp).transpose(0, 2, 1)   # flatten(2).transpose(1,2)
    return emb + pos_emb[None]


# --------------------------------- main --------------------------------------
if __name__ == "__main__":
    key = jax.random.PRNGKey(0)
    k1, k2, k3, k4 = jax.random.split(key, 4)

    B = 2
    C, H, P, D = CFG.num_channels, CFG.image_size, CFG.patch_size, CFG.hidden_size
    N = NUM_PATCHES

    pixel_values = jax.random.normal(k1, (B, C, H, H), jnp.float32)
    bound = 1.0 / (C * P * P) ** 0.5
    conv_w = jax.random.uniform(k2, (D, C, P, P), jnp.float32, -bound, bound)
    conv_b = jax.random.uniform(k3, (D,), jnp.float32, -bound, bound)
    pos_emb = 0.02 * jax.random.normal(k4, (N, D), jnp.float32)

    out = siglip_vision_embeddings(pixel_values, conv_w, conv_b, pos_emb)
    out = jax.block_until_ready(out)

    ref = reference_forward(pixel_values, conv_w, conv_b, pos_emb)
    assert out.shape == (B, N, D)
    err = float(jnp.max(jnp.abs(out - ref)))
    assert jnp.allclose(out, ref, atol=1e-4, rtol=1e-4), err

    print("KERNEL_OK")
</pallas_src>

<mosaic_0001>
module attributes {stable_mosaic.version = 11 : i64} {
  func.func @embeddings_kernel(%arg0: memref<32x48xf32, #tpu.memory_space<vmem>>, %arg1: memref<48x128xf32, #tpu.memory_space<vmem>>, %arg2: memref<1x128xf32, #tpu.memory_space<vmem>>, %arg3: memref<32x128xf32, #tpu.memory_space<vmem>>, %arg4: memref<32x128xf32, #tpu.memory_space<vmem>>) attributes {dimension_semantics = [], scalar_prefetch = 0 : i64, scratch_operands = 0 : i64, tpu.core_type = #tpu.core_type<tc>} {
    %c0 = arith.constant 0 : index
    %c0_0 = arith.constant 0 : index
    %0 = vector.load %arg0[%c0, %c0_0] : memref<32x48xf32, #tpu.memory_space<vmem>>, vector<32x48xf32>
    %c0_1 = arith.constant 0 : index
    %c0_2 = arith.constant 0 : index
    %1 = vector.load %arg1[%c0_1, %c0_2] : memref<48x128xf32, #tpu.memory_space<vmem>>, vector<48x128xf32>
    %cst = arith.constant dense<0.000000e+00> : vector<32x128xf32>
    %2 = tpu.matmul %0, %1, %cst {dimension_numbers = #tpu.dot_dimension_numbers<[1], [0], [0], [1], [0, 0, 1, 1], [], []>} : vector<32x48xf32>, vector<48x128xf32>, vector<32x128xf32> -> vector<32x128xf32>
    %c0_3 = arith.constant 0 : index
    %c0_4 = arith.constant 0 : index
    %3 = vector.load %arg2[%c0_3, %c0_4] : memref<1x128xf32, #tpu.memory_space<vmem>>, vector<1x128xf32>
    %4 = vector.broadcast %3 : vector<1x128xf32> to vector<32x128xf32>
    %5 = arith.addf %2, %4 : vector<32x128xf32>
    %c0_5 = arith.constant 0 : index
    %c0_6 = arith.constant 0 : index
    %6 = vector.load %arg3[%c0_5, %c0_6] : memref<32x128xf32, #tpu.memory_space<vmem>>, vector<32x128xf32>
    %7 = arith.addf %5, %6 : vector<32x128xf32>
    %c0_7 = arith.constant 0 : index
    %c0_8 = arith.constant 0 : index
    %8 = vector.load %arg4[%c0_7, %c0_8] : memref<32x128xf32, #tpu.memory_space<vmem>>, vector<32x128xf32>
    tpu.vector_store %arg4[%c0_7, %c0_8], %7 {strides = array<i32>} : memref<32x128xf32, #tpu.memory_space<vmem>>, vector<32x128xf32>,
    return
  }
}

</mosaic_0001>

<bundles_post_ra>
// kernel: tpu_custom_call.1
= control target key start
LH: loop header
LB: loop body
LE: loop exit
PB: predicated region body
PF: predicated region fallthrough
CT: control target
= control target key end

     0   :  { %9 = vsyncpa [#allocation3], 0  ;;  %s460_s0 = inlined_call_operand.hbm [shape: f32[32,48], index: 0, kind: input, shape index: {}]   ;;  %s461_s1 = inlined_call_operand.hbm [shape: f32[48,128], index: 1, kind: input, shape index: {}]   ;;  %s462_s2 = inlined_call_operand.vmem [shape: f32[1,128], index: 2, kind: input, shape index: {}]   ;;  %s463_s3 = inlined_call_operand.hbm [shape: f32[32,128], index: 3, kind: input, shape index: {}]   ;;  %s464_s4 = inlined_call_operand.hbm [shape: f32[32,128], index: 4, kind: output, shape index: {}]  }
   0x1   :  { %10 = vsyncpa [#allocation6], 0 }
   0x2   :  { %11 = vsyncpa [#allocation4], 0  ;;  %s355_s15 = smov [#allocation5]   ;;  %s356_s17 = smov [#allocation2]  }
   0x3   :  { %s29_s16 = sshll.u32 %s355_s15, 4  ;;  %s17_s18 = sshll.u32 %s356_s17, 4  ;;  %s30_s16 = int_to_ptr.vmem [resolvable:$true] %s29_s16  ;;  %s386_s18 = int_to_ptr.vmem [resolvable:$true] %s17_s18 }
   0x4   :  { %s261_s21 = scalar_lea.hbm %s461_s1, 768 }
   0x5   :  { %p262_p0 = scmp.ne.s32.totalorder %s461_s1, %s261_s21  ;;  %p265_p1 = scmp.lt.u32.totalorder %s261_s21, %s461_s1 }
   0x7   :  { %p267_p2 = pnand %p265_p1, %p262_p0 }
   0x9   :  { %270 = shalt.err (!%p267_p2)
}
   0xa   :  { %s271_s26 = scalar_lea.vmem %s30_s16, 768  ;;  %p276_p4 = scmp.lt.s32.totalorder %s30_s16, %s30_s16 }
   0xb   :  { %p272_p3 = scmp.ne.s32.totalorder %s30_s16, %s271_s26  ;;  %p277_p5 = scmp.lt.s32.totalorder %s271_s26, %s271_s26 }
   0xd   :  { %p278_p6 = por %p277_p5, %p276_p4 }
   0xf   :  { %p279_p7 = pnand %p278_p6, %p272_p3 }
  0x11   :  { %282 = shalt.err (!%p279_p7)
}
  0x12   :  { %s357_s27 = smov 128   ;;  %s358_s28 = smov 8  }
  0x13   :  { %35 = dma.hbm_to_vmem [thread:$0]  %s461_s1, 768, %s30_s16, [#allocation6], %s357_s27, %s357_s27, %s358_s28  }
  0x14   :  { %s283_s7 = scalar_lea.hbm %s460_s0, 512 }
  0x15   :  { %p284_p8 = scmp.ne.s32.totalorder %s460_s0, %s283_s7  ;;  %p287_p9 = scmp.lt.u32.totalorder %s283_s7, %s460_s0 }
  0x17   :  { %p289_p10 = pnand %p287_p9, %p284_p8 }
  0x19   :  { %292 = shalt.err (!%p289_p10)
}
  0x1a   :  { %s293_s12 = scalar_lea.vmem %s386_s18, 512  ;;  %p298_p12 = scmp.lt.s32.totalorder %s386_s18, %s386_s18 }
  0x1b   :  { %p294_p11 = scmp.ne.s32.totalorder %s386_s18, %s293_s12  ;;  %p299_p13 = scmp.lt.s32.totalorder %s293_s12, %s293_s12 }
  0x1d   :  { %p300_p0 = por %p299_p13, %p298_p12 }
  0x1f   :  { %p301_p1 = pnand %p300_p0, %p294_p11 }
  0x21   :  { %304 = shalt.err (!%p301_p1)
}
  0x22   :  { %23 = dma.hbm_to_vmem [thread:$0]  %s460_s0, 512, %s386_s18, [#allocation3], %s357_s27, %s357_s27, %s358_s28  }
  0x23   :  { %s359_s14 = smov [#allocation7]   ;;  %s305_s19 = scalar_lea.hbm %s463_s3, 512 }
  0x24   :  { %s43_s15 = sshll.u32 %s359_s14, 4  ;;  %p306_p2 = scmp.ne.s32.totalorder %s463_s3, %s305_s19  ;;  %s44_s15 = int_to_ptr.vmem [resolvable:$true] %s43_s15 }
  0x25   :  { %p309_p3 = scmp.lt.u32.totalorder %s305_s19, %s463_s3 }
  0x27   :  { %p311_p4 = pnand %p309_p3, %p306_p2 }
  0x29   :  { %314 = shalt.err (!%p311_p4)
}
  0x2a   :  { %s315_s24 = scalar_lea.vmem %s44_s15, 512  ;;  %p320_p6 = scmp.lt.s32.totalorder %s44_s15, %s44_s15 }
  0x2b   :  { %p316_p5 = scmp.ne.s32.totalorder %s44_s15, %s315_s24  ;;  %p321_p7 = scmp.lt.s32.totalorder %s315_s24, %s315_s24 }
  0x2d   :  { %p322_p8 = por %p321_p7, %p320_p6 }
  0x2f   :  { %p323_p9 = pnand %p322_p8, %p316_p5 }
  0x31   :  { %326 = shalt.err (!%p323_p9)
}
  0x32   :  { %49 = dma.hbm_to_vmem [thread:$0]  %s463_s3, 512, %s44_s15, [#allocation6], %s357_s27, %s357_s27, %s358_s28  }
  0x33   :  { %349 = dma.done.wait [#allocation3], 512  }
  0x34   :  { %350 = vsyncadd [#allocation3], 4294966784 }
  0x35   :  { %351 = dma.done.wait [#allocation6], 1280  }
  0x36   :  { %352 = vsyncadd [#allocation6], 4294966016  ;;  %v63_v0 = vld [vmem:[#allocation5] sm:$0xff]  ;;  %v64_v1 = vld [vmem:[#allocation5 + $0x8] sm:$0xff]  ;;  %vm76_vm0 = vcmask 392192   ;;  %s360_s26 = smov [#allocation8]  }
  0x37   :  { %v65_v2 = vld [vmem:[#allocation5 + $0x10] sm:$0xff]  ;;  %v237_v3 = vpack.c.bf16 %v64_v1, %v63_v0  ;;  %v66_v4 = vld [vmem:[#allocation5 + $0x18] sm:$0xff]  ;;  %v67_v6 = vld [vmem:[#allocation5 + $0x20] sm:$0xff]  ;;  %s191_s29 = sshll.u32 %s360_s26, 4  ;;  %s192_s29 = int_to_ptr.vmem [resolvable:$true] %s191_s29 }
  0x38   :  { %v241_v5 = vpack.c.bf16 %v66_v4, %v65_v2  ;;  %v68_v7 = vld [vmem:[#allocation5 + $0x28] sm:$0xff]  ;;  %v59_v8 = vld [vmem:[#allocation2] sm:$0xff]  ;;  %v61_v9 = vld [vmem:[#allocation2 + $0x10] sm:$0xff]  ;;  %p332_p11 = scmp.lt.s32.totalorder %s192_s29, %s192_s29 }
  0x39   :  { %238 = vmatprep.subr.bf16.mxu0 %v237_v3  ;;  %249 = vmatprep.subr.bf16.mxu1 %v237_v3  ;;  %v245_v10 = vpack.c.bf16 %v68_v7, %v67_v6  ;;  %v60_v11 = vld [vmem:[#allocation2 + $0x8] sm:$0xff]  ;;  %v62_v12 = vld [vmem:[#allocation2 + $0x18] sm:$0xff]  ;;  %v204_v13 = vld [vmem:[%s462_s2] ss:$0 sm:$0xff]  ;;  %s327_s2 = scalar_lea.vmem %s192_s29, 512 }
  0x3a   :  { %240 = vmatpush3.bf16.msra.mxu0 %v237_v3  ;;  %252 = vmatpush3.bf16.msra.mxu1 %v237_v3  ;;  %v175_v15 = vld [vmem:[#allocation7 + $0x8] sm:$0xff]  ;;  %v177_v17 = vld [vmem:[#allocation7 + $0x18] sm:$0xff]  ;;  %v174_v21 = vld [vmem:[#allocation7] sm:$0xff]  ;;  %p328_p10 = scmp.ne.s32.totalorder %s192_s29, %s327_s2  ;;  %p333_p12 = scmp.lt.s32.totalorder %s327_s2, %s327_s2 }
  0x3b   :  { %242 = vmatprep.subr.bf16.mxu0 %v241_v5  ;;  %250 = vmatprep.subr.bf16.mxu1 %v241_v5  ;;  %v176_v23 = vld [vmem:[#allocation7 + $0x10] sm:$0xff] }
  0x3c   :  { %231 = vmatprep.mubr.msk.f32.mxu0 %vm76_vm0, %v59_v8  ;;  %234 = vmatprep.mubr.msk.f32.mxu1 %vm76_vm0, %v61_v9  ;;  %p334_p13 = por %p333_p12, %p332_p11 }
  0x3e   :  { %244 = vmatpush3.bf16.msra.mxu0 %v241_v5  ;;  %253 = vmatpush3.bf16.msra.mxu1 %v241_v5  ;;  %p335_p0 = pnand %p334_p13, %p328_p10 }
  0x3f   :  { %246 = vmatprep.subr.bf16.mxu0 %v245_v10  ;;  %251 = vmatprep.subr.bf16.mxu1 %v245_v10 }
  0x42   :  { %248 = vmatpush3.bf16.msra.mxu0 %v245_v10  ;;  %254 = vmatpush3.bf16.msra.mxu1 %v245_v10 }
  0x45   :  { %232 = vmatmul.mubr.msk.f32.vlgmr.msra.gmra.mrb[0].mxu0 %vm76_vm0, %v60_v11  ;;  %235 = vmatmul.mubr.msk.f32.vlgmr.msra.gmra.mrb[0].mxu1 %vm76_vm0, %v62_v12 }
 0x118   :  { %v233_v14 = vpop.f32.mrb[0].mxu0  ;;  %v236_v16 = vpop.f32.mrb[0].mxu1 }
 0x119   :  { %v161_v18 = vadd.f32 %v233_v14, %v204_v13  ;;  %v171_v19 = vadd.f32 %v236_v16, %v204_v13  ;;  %v155_v20 = vpop.f32.mrb[1].mxu0  ;;  %v165_v22 = vpop.f32.mrb[1].mxu1 }
 0x11a   :  { %v156_v24 = vadd.f32 %v204_v13, %v155_v20  ;;  %v166_v25 = vadd.f32 %v204_v13, %v165_v22 }
 0x11b   :  { %v179_v26 = vadd.f32 %v175_v15, %v161_v18  ;;  %v181_v27 = vadd.f32 %v177_v17, %v171_v19 }
 0x11c   :  { %v178_v28 = vadd.f32 %v174_v21, %v156_v24  ;;  %v180_v29 = vadd.f32 %v176_v23, %v166_v25 }
 0x11d   :  { %183 = vst [vmem:[#allocation8 + $0x8] sm:$0xff] %v179_v26  ;;  %185 = vst [vmem:[#allocation8 + $0x18] sm:$0xff] %v181_v27 }
 0x11e   :  { %182 = vst [vmem:[#allocation8] sm:$0xff] %v178_v28  ;;  %184 = vst [vmem:[#allocation8 + $0x10] sm:$0xff] %v180_v29 }
 0x11f   :  { %338 = shalt.err (!%p335_p0)
}
 0x120   :  { %s339_s6 = scalar_lea.hbm %s464_s4, 512 }
 0x121   :  { %p340_p1 = scmp.ne.s32.totalorder %s464_s4, %s339_s6  ;;  %p343_p2 = scmp.lt.u32.totalorder %s339_s6, %s464_s4 }
 0x123   :  { %p345_p3 = pnand %p343_p2, %p340_p1 }
 0x125   :  { %348 = shalt.err (!%p345_p3)
}
 0x126   :  { %197 = dma.vmem_to_hbm [thread:$0]  %s192_s29, 512, %s464_s4, [#allocation4], %s357_s27, %s357_s27, %s358_s28  }
 0x127   :  { %353 = dma.done.wait [#allocation4], 512  }
 0x128   :  { %354 = vsyncadd [#allocation4], 4294966784 }
 0x129   :  { %201 = vsyncpa [#allocation3], 1 }
 0x12a   :  { %202 = vsyncpa [#allocation6], 1 }
 0x12b   :  { %203 = vsyncpa [#allocation4], 1 }

</bundles_post_ra>
